<compile_context>
chip_gen: v7x
topology: tpu7x:2x2x1
jax: 0.10.0
libtpu: 0.0.40
codegen_flags: <defaults>
</compile_context>

<pallas_src>
import math
import numpy as np
import jax
import jax.numpy as jnp
from jax.experimental import pallas as pl
from jax.experimental.pallas import tpu as pltpu

HIDDEN = 32   # hidden_size
BATCH = 2     # batch


# --------------------------------- kernel -----------------------------------
def rglru_kernel(h0_ref, h1_ref, w1_ref, b1_ref, w2_ref, o0_ref, o1_ref):
    H = HIDDEN
    h0 = h0_ref[...]                                    # (B, H)
    h1 = h1_ref[...]                                    # (B, H)

    # Stage 1: one fused dot. Columns: [lin (3H) | gate0 h0-part (H) | gate1 h1-part (H)]
    x = jnp.concatenate([h0, h1], axis=1)               # (B, 2H)
    s1 = jnp.dot(x, w1_ref[...],
                 preferred_element_type=jnp.float32) + b1_ref[...]   # (B, 5H)

    g = jax.nn.sigmoid(s1[:, 0:3 * H])                  # sigmoid(lin([h0,h1]))
    z = g[:, 0:H]
    r = g[:, H:2 * H]
    q = g[:, 2 * H:3 * H]
    g0_part = s1[:, 3 * H:4 * H]                        # h0 @ wg0[:H] + bg0
    g1_part = s1[:, 4 * H:5 * H]                        # h1 @ wg1[:H] + bg1

    # Stage 2: one block-diagonal dot for the gated halves.
    y = jnp.concatenate([h1 * r, h0 * q], axis=1)       # (B, 2H)
    s2 = jnp.dot(y, w2_ref[...],
                 preferred_element_type=jnp.float32)    # (B, 2H)

    h0_cap = jnp.tanh(g0_part + s2[:, 0:H])             # tanh(gate0([h0, h1*r]))
    h1_cap = jnp.tanh(g1_part + s2[:, H:2 * H])         # tanh(gate1([h1, h0*q]))

    o0_ref[...] = z * h1_cap + (1.0 - z) * h0
    o1_ref[...] = z * h0_cap + (1.0 - z) * h1


# --------------------------------- wrapper ----------------------------------
def fuse_weights(wlin, blin, wg0, bg0, wg1, bg1):
    """Block-pack the three Linear layers into (W1, b1, W2).

    Weight layout is (in_features, out_features) so the kernel does x @ W + b.
    """
    H = HIDDEN
    zeros = jnp.zeros((H, H), jnp.float32)
    w1 = jnp.concatenate([
        wlin,                                                  # (2H, 3H)
        jnp.concatenate([wg0[:H], zeros], axis=0),             # gate0, h0 part
        jnp.concatenate([zeros, wg1[:H]], axis=0),             # gate1, h1 part
    ], axis=1)                                                 # (2H, 5H)
    b1 = jnp.concatenate([blin, bg0, bg1]).reshape(1, 5 * H)   # (1, 5H)
    w2 = jnp.concatenate([
        jnp.concatenate([wg0[H:], zeros], axis=1),             # rows: h1*r
        jnp.concatenate([zeros, wg1[H:]], axis=1),             # rows: h0*q
    ], axis=0)                                                 # (2H, 2H)
    return w1, b1, w2


@jax.jit
def rglru_forward(h0, h1, w1, b1, w2):
    vmem = lambda: pl.BlockSpec(memory_space=pltpu.MemorySpace.VMEM)
    return pl.pallas_call(
        rglru_kernel,
        out_shape=(jax.ShapeDtypeStruct(h0.shape, jnp.float32),
                   jax.ShapeDtypeStruct(h1.shape, jnp.float32)),
        in_specs=[vmem() for _ in range(5)],
        out_specs=(vmem(), vmem()),
    )(h0, h1, w1, b1, w2)


def rglru_cell(inputs, fused):
    """Mirrors RGLRUCell.forward: accepts h0, (h0,), or (h0, h1)."""
    if not isinstance(inputs, tuple):
        inputs = (inputs,)
    if len(inputs) == 1:
        inputs = (inputs[0], jnp.zeros_like(inputs[0]))
    return rglru_forward(inputs[0], inputs[1], *fused)


# ----------------------------- pure-JAX reference ----------------------------
def ref_forward(h0, h1, wlin, blin, wg0, bg0, wg1, bg1):
    cat = jnp.concatenate([h0, h1], axis=1)
    g = jax.nn.sigmoid(cat @ wlin + blin)
    z, r, q = jnp.split(g, 3, axis=1)
    h0_cap = jnp.tanh(jnp.concatenate([h0, h1 * r], axis=1) @ wg0 + bg0)
    h1_cap = jnp.tanh(jnp.concatenate([h1, h0 * q], axis=1) @ wg1 + bg1)
    return z * h1_cap + (1.0 - z) * h0, z * h0_cap + (1.0 - z) * h1


# ------------------------------------ main -----------------------------------
if __name__ == "__main__":
    key = jax.random.PRNGKey(0)
    keys = jax.random.split(key, 8)
    H = HIDDEN
    stdv = 1.0 / math.sqrt(H)

    def u(k, shape):
        return jax.random.uniform(k, shape, jnp.float32, -stdv, stdv)

    # Raw per-Linear weights, stored pre-transposed as (in, out).
    wlin = u(keys[0], (2 * H, 3 * H))
    blin = u(keys[1], (3 * H,))
    wg0 = u(keys[2], (2 * H, H))
    bg0 = u(keys[3], (H,))
    wg1 = u(keys[4], (2 * H, H))
    bg1 = u(keys[5], (H,))

    h0 = jax.random.normal(keys[6], (BATCH, H), jnp.float32)
    h1 = jax.random.normal(keys[7], (BATCH, H), jnp.float32)

    fused = fuse_weights(wlin, blin, wg0, bg0, wg1, bg1)

    out0, out1 = rglru_cell((h0, h1), fused)
    jax.block_until_ready((out0, out1))

    assert out0.shape == (BATCH, H) and out1.shape == (BATCH, H)

    ref0, ref1 = ref_forward(h0, h1, wlin, blin, wg0, bg0, wg1, bg1)
    np.testing.assert_allclose(np.asarray(out0), np.asarray(ref0),
                               atol=1e-4, rtol=1e-4)
    np.testing.assert_allclose(np.asarray(out1), np.asarray(ref1),
                               atol=1e-4, rtol=1e-4)

    # Also exercise the "single input -> h1 = zeros" path of the module.
    out0s, out1s = rglru_cell(h0, fused)
    ref0s, ref1s = ref_forward(h0, jnp.zeros_like(h0),
                               wlin, blin, wg0, bg0, wg1, bg1)
    np.testing.assert_allclose(np.asarray(out0s), np.asarray(ref0s),
                               atol=1e-4, rtol=1e-4)
    np.testing.assert_allclose(np.asarray(out1s), np.asarray(ref1s),
                               atol=1e-4, rtol=1e-4)

    print("KERNEL_OK")
</pallas_src>

<mosaic_0001>
module attributes {stable_mosaic.version = 11 : i64} {
  func.func @rglru_kernel(%arg0: memref<2x32xf32, #tpu.memory_space<vmem>>, %arg1: memref<2x32xf32, #tpu.memory_space<vmem>>, %arg2: memref<64x160xf32, #tpu.memory_space<vmem>>, %arg3: memref<1x160xf32, #tpu.memory_space<vmem>>, %arg4: memref<64x64xf32, #tpu.memory_space<vmem>>, %arg5: memref<2x32xf32, #tpu.memory_space<vmem>>, %arg6: memref<2x32xf32, #tpu.memory_space<vmem>>) attributes {dimension_semantics = [], scalar_prefetch = 0 : i64, scratch_operands = 0 : i64, tpu.core_type = #tpu.core_type<tc>} {
    %c0 = arith.constant 0 : index
    %c0_0 = arith.constant 0 : index
    %0 = vector.load %arg0[%c0, %c0_0] : memref<2x32xf32, #tpu.memory_space<vmem>>, vector<2x32xf32>
    %c0_1 = arith.constant 0 : index
    %c0_2 = arith.constant 0 : index
    %1 = vector.load %arg1[%c0_1, %c0_2] : memref<2x32xf32, #tpu.memory_space<vmem>>, vector<2x32xf32>
    %2 = tpu.concatenate %0, %1 in 1 : vector<2x32xf32>, vector<2x32xf32> -> vector<2x64xf32>
    %c0_3 = arith.constant 0 : index
    %c0_4 = arith.constant 0 : index
    %3 = vector.load %arg2[%c0_3, %c0_4] : memref<64x160xf32, #tpu.memory_space<vmem>>, vector<64x160xf32>
    %cst = arith.constant dense<0.000000e+00> : vector<2x160xf32>
    %4 = tpu.matmul %2, %3, %cst {dimension_numbers = #tpu.dot_dimension_numbers<[1], [0], [0], [1], [0, 0, 1, 1], [], []>} : vector<2x64xf32>, vector<64x160xf32>, vector<2x160xf32> -> vector<2x160xf32>
    %c0_5 = arith.constant 0 : index
    %c0_6 = arith.constant 0 : index
    %5 = vector.load %arg3[%c0_5, %c0_6] : memref<1x160xf32, #tpu.memory_space<vmem>>, vector<1x160xf32>
    %6 = vector.broadcast %5 : vector<1x160xf32> to vector<2x160xf32>
    %7 = arith.addf %4, %6 : vector<2x160xf32>
    %8 = vector.extract_strided_slice %7 {offsets = [0, 0], sizes = [2, 96], strides = [1, 1]} : vector<2x160xf32> to vector<2x96xf32>
    %9 = arith.negf %8 : vector<2x96xf32>
    %10 = math.exp %9 : vector<2x96xf32>
    %cst_7 = arith.constant 1.000000e+00 : f32
    %11 = vector.broadcast %cst_7 : f32 to vector<2x96xf32>
    %12 = arith.addf %11, %10 : vector<2x96xf32>
    %13 = arith.divf %11, %12 : vector<2x96xf32>
    %14 = vector.extract_strided_slice %13 {offsets = [0, 0], sizes = [2, 32], strides = [1, 1]} : vector<2x96xf32> to vector<2x32xf32>
    %15 = vector.extract_strided_slice %13 {offsets = [0, 32], sizes = [2, 32], strides = [1, 1]} : vector<2x96xf32> to vector<2x32xf32>
    %16 = vector.extract_strided_slice %13 {offsets = [0, 64], sizes = [2, 32], strides = [1, 1]} : vector<2x96xf32> to vector<2x32xf32>
    %17 = vector.extract_strided_slice %7 {offsets = [0, 96], sizes = [2, 32], strides = [1, 1]} : vector<2x160xf32> to vector<2x32xf32>
    %18 = vector.extract_strided_slice %7 {offsets = [0, 128], sizes = [2, 32], strides = [1, 1]} : vector<2x160xf32> to vector<2x32xf32>
    %19 = arith.mulf %1, %15 : vector<2x32xf32>
    %20 = arith.mulf %0, %16 : vector<2x32xf32>
    %21 = tpu.concatenate %19, %20 in 1 : vector<2x32xf32>, vector<2x32xf32> -> vector<2x64xf32>
    %c0_8 = arith.constant 0 : index
    %c0_9 = arith.constant 0 : index
    %22 = vector.load %arg4[%c0_8, %c0_9] : memref<64x64xf32, #tpu.memory_space<vmem>>, vector<64x64xf32>
    %cst_10 = arith.constant dense<0.000000e+00> : vector<2x64xf32>
    %23 = tpu.matmul %21, %22, %cst_10 {dimension_numbers = #tpu.dot_dimension_numbers<[1], [0], [0], [1], [0, 0, 1, 1], [], []>} : vector<2x64xf32>, vector<64x64xf32>, vector<2x64xf32> -> vector<2x64xf32>
    %24 = vector.extract_strided_slice %23 {offsets = [0, 0], sizes = [2, 32], strides = [1, 1]} : vector<2x64xf32> to vector<2x32xf32>
    %25 = arith.addf %17, %24 : vector<2x32xf32>
    %26 = math.tanh %25 : vector<2x32xf32>
    %27 = vector.extract_strided_slice %23 {offsets = [0, 32], sizes = [2, 32], strides = [1, 1]} : vector<2x64xf32> to vector<2x32xf32>
    %28 = arith.addf %18, %27 : vector<2x32xf32>
    %29 = math.tanh %28 : vector<2x32xf32>
    %30 = arith.mulf %14, %29 : vector<2x32xf32>
    %cst_11 = arith.constant 1.000000e+00 : f32
    %31 = vector.broadcast %cst_11 : f32 to vector<2x32xf32>
    %32 = arith.subf %31, %14 : vector<2x32xf32>
    %33 = arith.mulf %32, %0 : vector<2x32xf32>
    %34 = arith.addf %30, %33 : vector<2x32xf32>
    %c0_12 = arith.constant 0 : index
    %c0_13 = arith.constant 0 : index
    %35 = vector.load %arg5[%c0_12, %c0_13] : memref<2x32xf32, #tpu.memory_space<vmem>>, vector<2x32xf32>
    tpu.vector_store %arg5[%c0_12, %c0_13], %34 {strides = array<i32>} : memref<2x32xf32, #tpu.memory_space<vmem>>, vector<2x32xf32>,
    %36 = arith.mulf %14, %26 : vector<2x32xf32>
    %cst_14 = arith.constant 1.000000e+00 : f32
    %37 = vector.broadcast %cst_14 : f32 to vector<2x32xf32>
    %38 = arith.subf %37, %14 : vector<2x32xf32>
    %39 = arith.mulf %38, %1 : vector<2x32xf32>
    %40 = arith.addf %36, %39 : vector<2x32xf32>
    %c0_15 = arith.constant 0 : index
    %c0_16 = arith.constant 0 : index
    %41 = vector.load %arg6[%c0_15, %c0_16] : memref<2x32xf32, #tpu.memory_space<vmem>>, vector<2x32xf32>
    tpu.vector_store %arg6[%c0_15, %c0_16], %40 {strides = array<i32>} : memref<2x32xf32, #tpu.memory_space<vmem>>, vector<2x32xf32>,
    return
  }
}

</mosaic_0001>

<bundles_post_ra>
// kernel: rglru_forward.1
= control target key start
LH: loop header
LB: loop body
LE: loop exit
PB: predicated region body
PF: predicated region fallthrough
CT: control target
= control target key end

     0   :  { %12 = vsyncpa [#allocation3], 0  ;;  %s664_s0 = inlined_call_operand.hbm [shape: f32[2,32], index: 0, kind: input, shape index: {}]   ;;  %s665_s1 = inlined_call_operand.vmem [shape: f32[2,32], index: 1, kind: input, shape index: {}]   ;;  %s666_s2 = inlined_call_operand.hbm [shape: f32[64,160], index: 2, kind: input, shape index: {}]   ;;  %s667_s3 = inlined_call_operand.vmem [shape: f32[1,160], index: 3, kind: input, shape index: {}]   ;;  %s668_s4 = inlined_call_operand.hbm [shape: f32[64,64], index: 4, kind: input, shape index: {}]   ;;  %s669_s5 = inlined_call_operand.hbm [shape: f32[2,32], index: 5, kind: output, shape index: {0}]   ;;  %s670_s6 = inlined_call_operand.hbm [shape: f32[2,32], index: 6, kind: output, shape index: {1}]  }
   0x1   :  { %13 = vsyncpa [#allocation6], 0 }
   0x2   :  { %14 = vsyncpa [#allocation4], 0 }
   0x3   :  { %15 = vsyncpa [#allocation10], 0  ;;  %s527_s21 = smov [#allocation5]   ;;  %s409_s25 = scalar_lea.hbm %s666_s2, 2048 }
   0x4   :  { %s33_s22 = sshll.u32 %s527_s21, 4  ;;  %p410_p0 = scmp.ne.s32.totalorder %s666_s2, %s409_s25  ;;  %s34_s22 = int_to_ptr.vmem [resolvable:$true] %s33_s22 }
   0x5   :  { %p413_p1 = scmp.lt.u32.totalorder %s409_s25, %s666_s2 }
   0x7   :  { %p415_p2 = pnand %p413_p1, %p410_p0 }
   0x9   :  { %418 = shalt.err (!%p415_p2)
}
   0xa   :  { %s419_s30 = scalar_lea.vmem %s34_s22, 2048  ;;  %p424_p4 = scmp.lt.s32.totalorder %s34_s22, %s34_s22 }
   0xb   :  { %p420_p3 = scmp.ne.s32.totalorder %s34_s22, %s419_s30  ;;  %p425_p5 = scmp.lt.s32.totalorder %s419_s30, %s419_s30 }
   0xd   :  { %p426_p6 = por %p425_p5, %p424_p4 }
   0xf   :  { %p427_p7 = pnand %p426_p6, %p420_p3 }
  0x11   :  { %430 = shalt.err (!%p427_p7)
}
  0x12   :  { %s528_s7 = smov 256   ;;  %s529_s8 = smov 16  }
  0x13   :  { %39 = dma.hbm_to_vmem [thread:$0]  %s666_s2, 2048, %s34_s22, [#allocation6], %s528_s7, %s528_s7, %s529_s8  }
  0x14   :  { %s530_s11 = smov [#allocation2]   ;;  %s531_s13 = smov [#allocation7]  }
  0x15   :  { %s22_s12 = sshll.u32 %s530_s11, 4  ;;  %s47_s14 = sshll.u32 %s531_s13, 4  ;;  %s23_s12 = int_to_ptr.vmem [resolvable:$true] %s22_s12  ;;  %s48_s14 = int_to_ptr.vmem [resolvable:$true] %s47_s14 }
  0x16   :  { %s431_s17 = scalar_lea.hbm %s664_s0, 32 }
  0x17   :  { %p432_p8 = scmp.ne.s32.totalorder %s664_s0, %s431_s17  ;;  %p435_p9 = scmp.lt.u32.totalorder %s431_s17, %s664_s0 }
  0x19   :  { %p437_p10 = pnand %p435_p9, %p432_p8 }
  0x1b   :  { %440 = shalt.err (!%p437_p10)
}
  0x1c   :  { %s441_s2 = scalar_lea.vmem %s23_s12, 32  ;;  %p446_p12 = scmp.lt.s32.totalorder %s23_s12, %s23_s12 }
  0x1d   :  { %p442_p11 = scmp.ne.s32.totalorder %s23_s12, %s441_s2  ;;  %p447_p13 = scmp.lt.s32.totalorder %s441_s2, %s441_s2 }
  0x1f   :  { %p448_p0 = por %p447_p13, %p446_p12 }
  0x21   :  { %p449_p1 = pnand %p448_p0, %p442_p11 }
  0x23   :  { %452 = shalt.err (!%p449_p1)
}
  0x24   :  { %25 = dma.hbm_to_vmem [thread:$0]  %s664_s0, 32, %s23_s12, [#allocation3]  }
  0x25   :  { %s453_s26 = scalar_lea.hbm %s668_s4, 1024 }
  0x26   :  { %p454_p2 = scmp.ne.s32.totalorder %s668_s4, %s453_s26  ;;  %p457_p3 = scmp.lt.u32.totalorder %s453_s26, %s668_s4 }
  0x28   :  { %p459_p4 = pnand %p457_p3, %p454_p2 }
  0x2a   :  { %462 = shalt.err (!%p459_p4)
}
  0x2b   :  { %s463_s7 = scalar_lea.vmem %s48_s14, 1024  ;;  %p468_p6 = scmp.lt.s32.totalorder %s48_s14, %s48_s14 }
  0x2c   :  { %p464_p5 = scmp.ne.s32.totalorder %s48_s14, %s463_s7  ;;  %p469_p7 = scmp.lt.s32.totalorder %s463_s7, %s463_s7 }
  0x2e   :  { %p470_p8 = por %p469_p7, %p468_p6 }
  0x30   :  { %p471_p9 = pnand %p470_p8, %p464_p5 }
  0x32   :  { %474 = shalt.err (!%p471_p9)
}
  0x33   :  { %s532_s0 = smov 128   ;;  %s533_s8 = smov 8  }
  0x34   :  { %53 = dma.hbm_to_vmem [thread:$0]  %s668_s4, 1024, %s48_s14, [#allocation6], %s532_s0, %s532_s0, %s533_s8  }
  0x35   :  { %519 = dma.done.wait [#allocation3], 32  }
  0x36   :  { %520 = vsyncadd [#allocation3], 4294967264 }
  0x37   :  { %521 = dma.done.wait [#allocation6], 3072  }
  0x38   :  { %522 = vsyncadd [#allocation6], 4294964224  ;;  %v534_v0 = vmov 0.0   ;;  %v617_v1 = vld [vmem:[%s665_s1] sm:$0x3]  ;;  %v72_v2 = vld [vmem:[#allocation5 + $0x8] sm:$0xff]  ;;  %v89_v29 = vlaneseq }
  0x39   :  { %167 = vmatprep.mubr.f32.mxu0 %v534_v0  ;;  %v74_v3 = vld [vmem:[#allocation5 + $0x18] sm:$0xff]  ;;  %s535_s13 = smov 32   ;;  %v71_v5 = vld [vmem:[#allocation5] sm:$0xff]  ;;  %v73_v6 = vld [vmem:[#allocation5 + $0x10] sm:$0xff]  ;;  %vm69_vm0 = vcmask 261120   ;;  %vm99_vm1 = vcmask 523264  }
  0x3a   :  { %66 = vrot.lane.b32.xlu0 %v617_v1, %s535_s13  ;;  %v358_v4 = vpack.c.bf16 %v74_v3, %v72_v2  ;;  %v76_v7 = vld [vmem:[#allocation5 + $0x28] sm:$0xff]  ;;  %v360_v8 = vpack.c.bf16 %v73_v6, %v71_v5  ;;  %v78_v9 = vld [vmem:[#allocation5 + $0x38] sm:$0xff]  ;;  %v75_v10 = vld [vmem:[#allocation5 + $0x20] sm:$0xff]  ;;  %v90_v30 = vshrl.u32 %v89_v29, 7  ;;  %v536_v43 = vmov 0.0|0.0   ;;  %s538_s14 = smov 64  }
  0x3b   :  { %v77_v11 = vld [vmem:[#allocation5 + $0x30] sm:$0xff]  ;;  %v362_v12 = vpack.c.bf16 %v78_v9, %v76_v7  ;;  %v80_v13 = vld [vmem:[#allocation5 + $0x48] sm:$0xff]  ;;  %v82_v14 = vld [vmem:[#allocation5 + $0x58] sm:$0xff]  ;;  %374 = vmatprep.subr.bf16.mxu1 %v536_v43  ;;  %vm539_vm2 = vmmov 0   ;;  %s540_s15 = smov [#allocation8]   ;;  %vm287_vm3 = vcmask 254976  }
  0x3c   :  { %359 = vmatprep.subr.bf16.mxu0 %v358_v4  ;;  %v364_v15 = vpack.c.bf16 %v77_v11, %v75_v10  ;;  %v366_v16 = vpack.c.bf16 %v82_v14, %v80_v13  ;;  %v79_v17 = vld [vmem:[#allocation5 + $0x40] sm:$0xff]  ;;  %v81_v18 = vld [vmem:[#allocation5 + $0x50] sm:$0xff]  ;;  %v84_v19 = vld [vmem:[#allocation5 + $0x68] sm:$0xff]  ;;  %v91_v31 = vsub.s32 0, %v90_v30  ;;  %355 = vmatprep.mubr.msk.f32.mxu1 %vm539_vm2, %v534_v0  ;;  %v95_v62 = vsub.s32 1, %v90_v30  ;;  %s303_s16 = sshll.u32 %s540_s15, 4  ;;  %s304_s16 = int_to_ptr.vmem [resolvable:$true] %s303_s16 }
  0x3d   :  { %361 = vmatpush1.bf16.msra.mxu0 %v360_v8  ;;  %v86_v20 = vld [vmem:[#allocation5 + $0x78] sm:$0xff]  ;;  %v368_v21 = vpack.c.bf16 %v81_v18, %v79_v17  ;;  %v83_v23 = vld [vmem:[#allocation5 + $0x60] sm:$0xff]  ;;  %v85_v24 = vld [vmem:[#allocation5 + $0x70] sm:$0xff]  ;;  %s475_s17 = scalar_lea.vmem %s304_s16, 32  ;;  %p480_p11 = scmp.lt.s32.totalorder %s304_s16, %s304_s16 }
  0x3e   :  { %363 = vmatprep.subr.bf16.mxu0 %v362_v12  ;;  %v370_v22 = vpack.c.bf16 %v86_v20, %v84_v19  ;;  %v372_v25 = vpack.c.bf16 %v85_v24, %v83_v23  ;;  %v621_v26 = vld [vmem:[#allocation2] sm:$0x3]  ;;  %v194_v40 = vld [vmem:[#allocation7] sm:$0xff]  ;;  %v195_v41 = vld [vmem:[#allocation7 + $0x8] sm:$0xff]  ;;  %p476_p10 = scmp.ne.s32.totalorder %s304_s16, %s475_s17  ;;  %p481_p12 = scmp.lt.s32.totalorder %s475_s17, %s475_s17 }
  0x3f   :  { %v87_v32 = vld [vmem:[%s667_s3] sm:$0x3]  ;;  %v196_v42 = vld [vmem:[#allocation7 + $0x10] sm:$0xff]  ;;  %v375_v44 = vpack.c.bf16 %v195_v41, %v194_v40  ;;  %v198_v47 = vld [vmem:[#allocation7 + $0x20] sm:$0xff]  ;;  %s537_s3 = smov 96  }
  0x40   :  { %v92_v33 = vrot.slane %v87_v32, %v91_v31  ;;  %v197_v45 = vld [vmem:[#allocation7 + $0x18] sm:$0xff]  ;;  %v199_v48 = vld [vmem:[#allocation7 + $0x28] sm:$0xff]  ;;  %v200_v50 = vld [vmem:[#allocation7 + $0x30] sm:$0xff]  ;;  %v96_v63 = vrot.slane %v87_v32, %v95_v62  ;;  %p482_p13 = por %p481_p12, %p480_p11 }
  0x41   :  { %365 = vmatpush1.bf16.msra.mxu0 %v364_v15  ;;  %376 = vmatpush3.bf16.msra.mxu1 %v375_v44  ;;  %v378_v46 = vpack.c.bf16 %v197_v45, %v196_v42  ;;  %v381_v49 = vpack.c.bf16 %v199_v48, %v198_v47  ;;  %v201_v51 = vld [vmem:[#allocation7 + $0x38] sm:$0xff] }
  0x42   :  { %367 = vmatprep.subr.bf16.mxu0 %v366_v16  ;;  %377 = vmatprep.subr.bf16.mxu1 %v536_v43  ;;  %v384_v53 = vpack.c.bf16 %v201_v51, %v200_v50  ;;  %p483_p0 = pnand %p482_p13, %p476_p10 }
  0x45   :  { %369 = vmatpush1.bf16.msra.mxu0 %v368_v21  ;;  %379 = vmatpush3.bf16.msra.mxu1 %v378_v46 }
  0x46   :  { %371 = vmatprep.subr.bf16.mxu0 %v370_v22  ;;  %380 = vmatprep.subr.bf16.mxu1 %v536_v43 }
  0x49   :  { %373 = vmatpush1.bf16.msra.mxu0 %v372_v25  ;;  %382 = vmatpush3.bf16.msra.mxu1 %v381_v49 }
  0x4a   :  { %383 = vmatprep.subr.bf16.mxu1 %v536_v43 }
  0x4d   :  { %385 = vmatpush3.bf16.msra.mxu1 %v384_v53 }
  0xac   :  { %v67_v27 = vpop.permute.xlu0 %66 }
  0xad   :  { %v70_v28 = vsel %vm69_vm0, %v621_v26, %v67_v27 }
  0xae   :  { %327 = vmatmul.mubr.msk.f32.vlgmr.msra.gmra.mrb[0].mxu0 %vm99_vm1, %v70_v28 }
 0x181   :  { %v169_v34 = vpop.f32.mrb[0].mxu0 }
 0x182   :  { %v170_v35 = vadd.f32 %v169_v34, %v92_v33  ;;  %v171_v36 = vpop.f32.mrb[1].mxu0 }
 0x183   :  { %v172_v2 = vadd.f32 %v171_v36, %v96_v63 }
 0x184   :  { %v328_v37 = vmul.f32 -1.442695, %v170_v35 }
 0x186   :  { %401 = vpow2.f32 %v328_v37 }
 0x190   :  { %v402_v38 = vpop.eup %401 }
 0x191   :  { %v177_v39 = vadd.f32 1.0, %v402_v38 }
 0x193   :  { %403 = vrcp.f32 %v177_v39 }
 0x19d   :  { %v404_v52 = vpop.eup %403 }
 0x19e   :  { %181 = vrot.lane.b32.xlu1 %v404_v52, %s537_s3  ;;  %185 = vrot.lane.b32.xlu0 %v404_v52, %s538_s14  ;;  %v284_v5 = vsub.f32 1.0, %v404_v52 }
 0x1a0   :  { %v285_v9 = vmul.f32 %v284_v5, %v621_v26 }
 0x210   :  { %v186_v54 = vpop.permute.xlu0 %185  ;;  %v182_v56 = vpop.permute.xlu1 %181 }
 0x211   :  { %v188_v55 = vmul.f32 %v186_v54, %v621_v26  ;;  %v184_v57 = vmul.f32 %v182_v56, %v617_v1 }
 0x213   :  { %190 = vrot.lane.b32.xlu1 %v188_v55, %s535_s13 }
 0x285   :  { %v191_v58 = vpop.permute.xlu1 %190 }
 0x286   :  { %v193_v59 = vsel %vm69_vm0, %v184_v57, %v191_v58 }
 0x287   :  { %356 = vmatmul.mubr.msk.f32.vlgmr.msra.gmra.mrb[0].mxu1 %vm99_vm1, %v193_v59 }
 0x35a   :  { %v271_v60 = vpop.f32.mrb[0].mxu1 }
 0x35b   :  { %276 = vrot.lane.b32.xlu0 %v271_v60, %s537_s3  ;;  %v357_v61 = vpop.f32.mrb[1].mxu1 }
 0x3cd   :  { %v277_v0 = vpop.permute.xlu0 %276 }
 0x3ce   :  { %v279_v3 = vadd.f32 %v277_v0, %v170_v35  ;;  %v281_v4 = vadd.f32 %v277_v0, %v172_v2 }
 0x3d0   :  { %405 = vtanh.f32 %v279_v3 }
 0x3d1   :  { %407 = vtanh.f32 %v281_v4 }
 0x3da   :  { %v406_v6 = vpop.eup %405 }
 0x3db   :  { %v408_v7 = vpop.eup %407  ;;  %290 = vrot.lane.b32.xlu1 %v406_v6, %s535_s13 }
 0x3dc   :  { %v283_v8 = vmul.f32 %v408_v7, %v404_v52 }
 0x3de   :  { %v286_v10 = vadd.f32 %v285_v9, %v283_v8 }
 0x3e0   :  { %288 = vst.msk [vmem:[#allocation8] sm:$0x3] %vm287_vm3, %v286_v10 }
 0x3e1   :  { %486 = shalt.err (!%p483_p0)
}
 0x3e2   :  { %s487_s20 = scalar_lea.hbm %s669_s5, 32 }
 0x3e3   :  { %p488_p1 = scmp.ne.s32.totalorder %s669_s5, %s487_s20  ;;  %p491_p2 = scmp.lt.u32.totalorder %s487_s20, %s669_s5 }
 0x3e5   :  { %p493_p3 = pnand %p491_p2, %p488_p1 }
 0x3e7   :  { %496 = shalt.err (!%p493_p3)
}
 0x3e8   :  { %306 = dma.vmem_to_hbm [thread:$0]  %s304_s16, 32, %s669_s5, [#allocation4]   ;;  %v294_v13 = vmul.f32 %v284_v5, %v617_v1 }
 0x3e9   :  { %s541_s26 = smov [#allocation9]  }
 0x3ea   :  { %s313_s27 = sshll.u32 %s541_s26, 4  ;;  %s314_s27 = int_to_ptr.vmem [resolvable:$true] %s313_s27 }
 0x3eb   :  { %s497_s28 = scalar_lea.vmem %s314_s27, 32  ;;  %p502_p5 = scmp.lt.s32.totalorder %s314_s27, %s314_s27 }
 0x3ec   :  { %p498_p4 = scmp.ne.s32.totalorder %s314_s27, %s497_s28  ;;  %p503_p6 = scmp.lt.s32.totalorder %s497_s28, %s497_s28 }
 0x3ee   :  { %p504_p7 = por %p503_p6, %p502_p5 }
 0x3f0   :  { %p505_p8 = pnand %p504_p7, %p498_p4 }
 0x44d   :  { %v291_v11 = vpop.permute.xlu1 %290 }
 0x44e   :  { %v293_v12 = vmul.f32 %v404_v52, %v291_v11 }
 0x450   :  { %v295_v14 = vadd.f32 %v294_v13, %v293_v12 }
 0x452   :  { %296 = vst.msk [vmem:[#allocation9] sm:$0x3] %vm287_vm3, %v295_v14 }
 0x453   :  { %508 = shalt.err (!%p505_p8)
}
 0x454   :  { %s509_s5 = scalar_lea.hbm %s670_s6, 32 }
 0x455   :  { %p510_p9 = scmp.ne.s32.totalorder %s670_s6, %s509_s5  ;;  %p513_p10 = scmp.lt.u32.totalorder %s509_s5, %s670_s6 }
 0x457   :  { %p515_p11 = pnand %p513_p10, %p510_p9 }
 0x459   :  { %518 = shalt.err (!%p515_p11)
}
 0x45a   :  { %316 = dma.vmem_to_hbm [thread:$0]  %s314_s27, 32, %s670_s6, [#allocation10]  }
 0x45b   :  { %523 = dma.done.wait [#allocation4], 32  }
 0x45c   :  { %524 = vsyncadd [#allocation4], 4294967264 }
 0x45d   :  { %525 = dma.done.wait [#allocation10], 32  }
 0x45e   :  { %526 = vsyncadd [#allocation10], 4294967264 }
 0x45f   :  { %323 = vsyncpa [#allocation3], 1 }
 0x460   :  { %324 = vsyncpa [#allocation6], 1 }
 0x461   :  { %325 = vsyncpa [#allocation4], 1 }
 0x462   :  { %326 = vsyncpa [#allocation10], 1 }

</bundles_post_ra>
